<compile_context>
chip_gen: v7x
topology: tpu7x:2x2x1
jax: 0.10.0
libtpu: 0.0.40
codegen_flags: <defaults>
</compile_context>

<pallas_src>
import math

import jax
import jax.numpy as jnp
from jax import lax
from jax.experimental import pallas as pl
from jax.experimental.pallas import tpu as pltpu

LN_EPS = 1e-5
_INV_SQRT2 = 1.0 / math.sqrt(2.0)


def _resblock_kernel(x_ref, g_ref, b_ref, w1_ref, b1_ref, w2_ref, b2_ref, o_ref):
    # ---- LayerNorm over channels (f32); `x` dies right after this block. ----
    x = x_ref[...].astype(jnp.float32)                            # (TM, C)
    mean = jnp.mean(x, axis=-1, keepdims=True)
    xc = x - mean
    var = jnp.mean(xc * xc, axis=-1, keepdims=True)
    xn = xc * lax.rsqrt(var + LN_EPS) * g_ref[...] + b_ref[...]   # (TM, C) f32

    # ---- proj: Linear -> GELU -> Linear.  MXU work in bf16, f32 accumulate. --
    h = jnp.dot(xn.astype(jnp.bfloat16), w1_ref[...],
                preferred_element_type=jnp.float32) + b1_ref[...]
    h = 0.5 * h * (1.0 + lax.erf(h * _INV_SQRT2))                 # exact GELU (f32)
    y = jnp.dot(h.astype(jnp.bfloat16), w2_ref[...],
                preferred_element_type=jnp.float32) + b2_ref[...]

    # ---- residual with the *normed* x (f32), cast once on the store. --------
    o_ref[...] = (xn + y).astype(o_ref.dtype)


def _round_up(n, m):
    return ((n + m - 1) // m) * m


def _build_call(out_dtype, m_pad, c, tm, vmem_limit, single_buffer_params):
    """Builds the pallas_call; optionally single-buffers grid-invariant params."""

    def const_spec(shape):
        idx = lambda i, _shape=shape: (0,) * len(_shape)
        if single_buffer_params:
            return pl.BlockSpec(shape, idx, pipeline_mode=pl.Buffered(1))
        return pl.BlockSpec(shape, idx)

    return pl.pallas_call(
        _resblock_kernel,
        out_shape=jax.ShapeDtypeStruct((m_pad, c), out_dtype),
        grid_spec=pltpu.PrefetchScalarGridSpec(
            num_scalar_prefetch=0,
            grid=(m_pad // tm,),
            in_specs=[
                pl.BlockSpec((tm, c), lambda i: (i, 0)),   # x tile (pipelined)
                const_spec((1, c)),                        # gamma
                const_spec((1, c)),                        # beta
                const_spec((c, c)),                        # w1 (bf16)
                const_spec((1, c)),                        # b1
                const_spec((c, c)),                        # w2 (bf16)
                const_spec((1, c)),                        # b2
            ],
            out_specs=pl.BlockSpec((tm, c), lambda i: (i, 0)),
        ),
        compiler_params=pltpu.CompilerParams(
            dimension_semantics=("parallel",),            # shards over v7x's 2 TCs
            vmem_limit_bytes=vmem_limit,
        ),
    )


def simple_res_block(x, gamma, beta, w1, b1, w2, b2, *, tile_m=256):
    """x: (..., C). gamma/beta/b1/b2: (C,), w1/w2: (C, C) applied as x @ W."""
    orig_shape = x.shape
    C = orig_shape[-1]
    x2 = x.reshape(-1, C)
    M = x2.shape[0]

    # Token tile: large (fills the MXU, amortises pipeline overhead), 8-aligned,
    # clamped to the token count; ragged last tile handled by zero padding.
    tm = min(_round_up(tile_m, 8), _round_up(max(M, 8), 8))
    m_pad = int(pl.cdiv(M, tm)) * tm
    if m_pad != M:
        x2 = jnp.pad(x2, ((0, m_pad - M), (0, 0)))

    # bf16 weights for the MXU; per-channel params stay f32 as 1-row slabs.
    w1b = w1.astype(jnp.bfloat16)
    w2b = w2.astype(jnp.bfloat16)
    g2 = gamma.reshape(1, C).astype(jnp.float32)
    be2 = beta.reshape(1, C).astype(jnp.float32)
    b1_2 = b1.reshape(1, C).astype(jnp.float32)
    b2_2 = b2.reshape(1, C).astype(jnp.float32)

    # Explicit VMEM budget: double-buffered x/out tiles + single-buffered bf16
    # weights + f32 intermediates, with headroom; clamped for v7x (64 MiB/TC).
    itemsize = jnp.dtype(x2.dtype).itemsize
    budget = (2 * tm * C * itemsize            # input tile, double-buffered
              + 2 * tm * C * itemsize          # output tile, double-buffered
              + 2 * C * C * 2                  # two bf16 weights, single-buffered
              + 8 * C * 4                      # per-channel params
              + 4 * tm * C * 4)                # f32 intermediates (xn, h, y, acc)
    vmem_limit = max(32 << 20, min(int(1.25 * budget) + (4 << 20), 64 << 20))

    args = (x2, g2, be2, w1b, b1_2, w2b, b2_2)
    try:
        out = jax.block_until_ready(
            _build_call(x.dtype, m_pad, C, tm, vmem_limit, True)(*args))
    except Exception:
        # Fallback for jax versions without pipeline_mode single-buffering;
        # identical math, default (double) buffering of the invariant params.
        out = _build_call(x.dtype, m_pad, C, tm, vmem_limit, False)(*args)

    if m_pad != M:
        out = out[:M]
    return out.reshape(orig_shape)


def _reference(x, gamma, beta, w1, b1, w2, b2):
    xf = x.astype(jnp.float32)
    mean = jnp.mean(xf, axis=-1, keepdims=True)
    var = jnp.mean((xf - mean) ** 2, axis=-1, keepdims=True)
    xn = (xf - mean) / jnp.sqrt(var + LN_EPS) * gamma + beta
    h = xn @ w1 + b1
    h = 0.5 * h * (1.0 + lax.erf(h * _INV_SQRT2))
    y = h @ w2 + b2
    return (xn + y).astype(x.dtype)


if __name__ == "__main__":
    # channels kept 128-aligned so output stores are lane-dense (matches real model sizes).
    B, S, C = 2, 8, 128

    key = jax.random.PRNGKey(0)
    kx, kg, kb, kw1, kb1, kw2, kb2 = jax.random.split(key, 7)

    x = jax.random.normal(kx, (B, S, C), dtype=jnp.float32)

    # Deterministic synthetic parameters (shapes from nn.LayerNorm(C), nn.Linear(C, C)).
    gamma = 1.0 + 0.1 * jax.random.normal(kg, (C,), dtype=jnp.float32)
    beta = 0.1 * jax.random.normal(kb, (C,), dtype=jnp.float32)
    w1 = jax.random.normal(kw1, (C, C), dtype=jnp.float32) / jnp.sqrt(C)
    b1 = 0.1 * jax.random.normal(kb1, (C,), dtype=jnp.float32)
    w2 = jax.random.normal(kw2, (C, C), dtype=jnp.float32) / jnp.sqrt(C)
    b2 = 0.1 * jax.random.normal(kb2, (C,), dtype=jnp.float32)

    out = simple_res_block(x, gamma, beta, w1, b1, w2, b2)
    out = jax.block_until_ready(out)

    ref = _reference(x, gamma, beta, w1, b1, w2, b2)
    assert out.shape == x.shape and out.dtype == x.dtype
    # bf16 MXU operands (f32 accumulation) => loosened tolerance vs the f32 reference.
    max_diff = float(jnp.max(jnp.abs(out - ref)))
    assert jnp.allclose(out, ref, atol=5e-2, rtol=5e-2), (
        f"mismatch vs reference; max abs diff = {max_diff}")

    print("KERNEL_OK")
</pallas_src>

<mosaic_0001>
module attributes {stable_mosaic.version = 11 : i64} {
  func.func @_resblock_kernel(%arg0: i32, %arg1: memref<16x128xf32, #tpu.memory_space<vmem>>, %arg2: memref<1x128xf32, #tpu.memory_space<vmem>>, %arg3: memref<1x128xf32, #tpu.memory_space<vmem>>, %arg4: memref<128x128xbf16, #tpu.memory_space<vmem>>, %arg5: memref<1x128xf32, #tpu.memory_space<vmem>>, %arg6: memref<128x128xbf16, #tpu.memory_space<vmem>>, %arg7: memref<1x128xf32, #tpu.memory_space<vmem>>, %arg8: memref<16x128xf32, #tpu.memory_space<vmem>>) attributes {dimension_semantics = [#tpu.dimension_semantics<parallel>], iteration_bounds = array<i64: 1>, scalar_prefetch = 0 : i64, scratch_operands = 0 : i64, tpu.core_type = #tpu.core_type<tc>, window_params = [{transform_indices = @transform_0, window_bounds = array<i64: 16, 128>}, {pipeline_mode = #tpu.pipeline_mode<synchronous>, transform_indices = @transform_1, window_bounds = array<i64: 1, 128>}, {pipeline_mode = #tpu.pipeline_mode<synchronous>, transform_indices = @transform_2, window_bounds = array<i64: 1, 128>}, {pipeline_mode = #tpu.pipeline_mode<synchronous>, transform_indices = @transform_3, window_bounds = array<i64: 128, 128>}, {pipeline_mode = #tpu.pipeline_mode<synchronous>, transform_indices = @transform_4, window_bounds = array<i64: 1, 128>}, {pipeline_mode = #tpu.pipeline_mode<synchronous>, transform_indices = @transform_5, window_bounds = array<i64: 128, 128>}, {pipeline_mode = #tpu.pipeline_mode<synchronous>, transform_indices = @transform_6, window_bounds = array<i64: 1, 128>}, {transform_indices = @transform_7, window_bounds = array<i64: 16, 128>}]} {
    %c0 = arith.constant 0 : index
    %c0_0 = arith.constant 0 : index
    %0 = vector.load %arg1[%c0, %c0_0] : memref<16x128xf32, #tpu.memory_space<vmem>>, vector<16x128xf32>
    %cst = arith.constant dense<0.000000e+00> : vector<16xf32>
    %1 = vector.multi_reduction <add>, %0, %cst [1] : vector<16x128xf32> to vector<16xf32>
    %2 = vector.shape_cast %1 : vector<16xf32> to vector<16x1xf32>
    %cst_1 = arith.constant 1.280000e+02 : f32
    %3 = vector.broadcast %cst_1 : f32 to vector<16x1xf32>
    %4 = arith.divf %2, %3 : vector<16x1xf32>
    %5 = vector.broadcast %4 : vector<16x1xf32> to vector<16x128xf32>
    %6 = arith.subf %0, %5 : vector<16x128xf32>
    %7 = arith.mulf %6, %6 : vector<16x128xf32>
    %cst_2 = arith.constant dense<0.000000e+00> : vector<16xf32>
    %8 = vector.multi_reduction <add>, %7, %cst_2 [1] : vector<16x128xf32> to vector<16xf32>
    %9 = vector.shape_cast %8 : vector<16xf32> to vector<16x1xf32>
    %cst_3 = arith.constant 1.280000e+02 : f32
    %10 = vector.broadcast %cst_3 : f32 to vector<16x1xf32>
    %11 = arith.divf %9, %10 : vector<16x1xf32>
    %cst_4 = arith.constant 9.99999974E-6 : f32
    %12 = vector.broadcast %cst_4 : f32 to vector<16x1xf32>
    %13 = arith.addf %11, %12 : vector<16x1xf32>
    %14 = math.rsqrt %13 : vector<16x1xf32>
    %15 = vector.broadcast %14 : vector<16x1xf32> to vector<16x128xf32>
    %16 = arith.mulf %6, %15 : vector<16x128xf32>
    %c0_5 = arith.constant 0 : index
    %c0_6 = arith.constant 0 : index
    %17 = vector.load %arg2[%c0_5, %c0_6] : memref<1x128xf32, #tpu.memory_space<vmem>>, vector<1x128xf32>
    %18 = vector.broadcast %17 : vector<1x128xf32> to vector<16x128xf32>
    %19 = arith.mulf %16, %18 : vector<16x128xf32>
    %c0_7 = arith.constant 0 : index
    %c0_8 = arith.constant 0 : index
    %20 = vector.load %arg3[%c0_7, %c0_8] : memref<1x128xf32, #tpu.memory_space<vmem>>, vector<1x128xf32>
    %21 = vector.broadcast %20 : vector<1x128xf32> to vector<16x128xf32>
    %22 = arith.addf %19, %21 : vector<16x128xf32>
    %23 = arith.truncf %22 : vector<16x128xf32> to vector<16x128xbf16>
    %c0_9 = arith.constant 0 : index
    %c0_10 = arith.constant 0 : index
    %24 = vector.load %arg4[%c0_9, %c0_10] : memref<128x128xbf16, #tpu.memory_space<vmem>>, vector<128x128xbf16>
    %cst_11 = arith.constant dense<0.000000e+00> : vector<16x128xf32>
    %25 = tpu.matmul %23, %24, %cst_11 {dimension_numbers = #tpu.dot_dimension_numbers<[1], [0], [0], [1], [0, 0, 1, 1], [], []>} : vector<16x128xbf16>, vector<128x128xbf16>, vector<16x128xf32> -> vector<16x128xf32>
    %c0_12 = arith.constant 0 : index
    %c0_13 = arith.constant 0 : index
    %26 = vector.load %arg5[%c0_12, %c0_13] : memref<1x128xf32, #tpu.memory_space<vmem>>, vector<1x128xf32>
    %27 = vector.broadcast %26 : vector<1x128xf32> to vector<16x128xf32>
    %28 = arith.addf %25, %27 : vector<16x128xf32>
    %cst_14 = arith.constant 5.000000e-01 : f32
    %29 = vector.broadcast %cst_14 : f32 to vector<16x128xf32>
    %30 = arith.mulf %29, %28 : vector<16x128xf32>
    %cst_15 = arith.constant 0.707106769 : f32
    %31 = vector.broadcast %cst_15 : f32 to vector<16x128xf32>
    %32 = arith.mulf %28, %31 : vector<16x128xf32>
    %33 = math.erf %32 : vector<16x128xf32>
    %cst_16 = arith.constant 1.000000e+00 : f32
    %34 = vector.broadcast %cst_16 : f32 to vector<16x128xf32>
    %35 = arith.addf %34, %33 : vector<16x128xf32>
    %36 = arith.mulf %30, %35 : vector<16x128xf32>
    %37 = arith.truncf %36 : vector<16x128xf32> to vector<16x128xbf16>
    %c0_17 = arith.constant 0 : index
    %c0_18 = arith.constant 0 : index
    %38 = vector.load %arg6[%c0_17, %c0_18] : memref<128x128xbf16, #tpu.memory_space<vmem>>, vector<128x128xbf16>
    %cst_19 = arith.constant dense<0.000000e+00> : vector<16x128xf32>
    %39 = tpu.matmul %37, %38, %cst_19 {dimension_numbers = #tpu.dot_dimension_numbers<[1], [0], [0], [1], [0, 0, 1, 1], [], []>} : vector<16x128xbf16>, vector<128x128xbf16>, vector<16x128xf32> -> vector<16x128xf32>
    %c0_20 = arith.constant 0 : index
    %c0_21 = arith.constant 0 : index
    %40 = vector.load %arg7[%c0_20, %c0_21] : memref<1x128xf32, #tpu.memory_space<vmem>>, vector<1x128xf32>
    %41 = vector.broadcast %40 : vector<1x128xf32> to vector<16x128xf32>
    %42 = arith.addf %39, %41 : vector<16x128xf32>
    %43 = arith.addf %22, %42 : vector<16x128xf32>
    %c0_22 = arith.constant 0 : index
    %c0_23 = arith.constant 0 : index
    %44 = vector.load %arg8[%c0_22, %c0_23] : memref<16x128xf32, #tpu.memory_space<vmem>>, vector<16x128xf32>
    tpu.vector_store %arg8[%c0_22, %c0_23], %43 {strides = array<i32>} : memref<16x128xf32, #tpu.memory_space<vmem>>, vector<16x128xf32>,
    return
  }
  func.func @transform_0(%arg0: i32) -> (i32, i32) {
    %c0_i32 = arith.constant 0 : i32
    %c0_i32_0 = arith.constant 0 : i32
    return %arg0, %c0_i32 : i32, i32
  }
  func.func @transform_1(%arg0: i32) -> (i32, i32) {
    %c0_i32 = arith.constant 0 : i32
    %c0_i32_0 = arith.constant 0 : i32
    %c0_i32_1 = arith.constant 0 : i32
    return %c0_i32, %c0_i32_0 : i32, i32
  }
  func.func @transform_2(%arg0: i32) -> (i32, i32) {
    %c0_i32 = arith.constant 0 : i32
    %c0_i32_0 = arith.constant 0 : i32
    %c0_i32_1 = arith.constant 0 : i32
    return %c0_i32, %c0_i32_0 : i32, i32
  }
  func.func @transform_3(%arg0: i32) -> (i32, i32) {
    %c0_i32 = arith.constant 0 : i32
    %c0_i32_0 = arith.constant 0 : i32
    %c0_i32_1 = arith.constant 0 : i32
    return %c0_i32, %c0_i32_0 : i32, i32
  }
  func.func @transform_4(%arg0: i32) -> (i32, i32) {
    %c0_i32 = arith.constant 0 : i32
    %c0_i32_0 = arith.constant 0 : i32
    %c0_i32_1 = arith.constant 0 : i32
    return %c0_i32, %c0_i32_0 : i32, i32
  }
  func.func @transform_5(%arg0: i32) -> (i32, i32) {
    %c0_i32 = arith.constant 0 : i32
    %c0_i32_0 = arith.constant 0 : i32
    %c0_i32_1 = arith.constant 0 : i32
    return %c0_i32, %c0_i32_0 : i32, i32
  }
  func.func @transform_6(%arg0: i32) -> (i32, i32) {
    %c0_i32 = arith.constant 0 : i32
    %c0_i32_0 = arith.constant 0 : i32
    %c0_i32_1 = arith.constant 0 : i32
    return %c0_i32, %c0_i32_0 : i32, i32
  }
  func.func @transform_7(%arg0: i32) -> (i32, i32) {
    %c0_i32 = arith.constant 0 : i32
    %c0_i32_0 = arith.constant 0 : i32
    return %arg0, %c0_i32 : i32, i32
  }
}

module attributes {stable_mosaic.version = 11 : i64} {
  func.func @_resblock_kernel(%arg0: i32, %arg1: memref<16x128xf32, #tpu.memory_space<vmem>>, %arg2: memref<1x128xf32, #tpu.memory_space<vmem>>, %arg3: memref<1x128xf32, #tpu.memory_space<vmem>>, %arg4: memref<128x128xbf16, #tpu.memory_space<vmem>>, %arg5: memref<1x128xf32, #tpu.memory_space<vmem>>, %arg6: memref<128x128xbf16, #tpu.memory_space<vmem>>, %arg7: memref<1x128xf32, #tpu.memory_space<vmem>>, %arg8: memref<16x128xf32, #tpu.memory_space<vmem>>) attributes {dimension_semantics = [#tpu.dimension_semantics<parallel>], iteration_bounds = array<i64: 1>, scalar_prefetch = 0 : i64, scratch_operands = 0 : i64, tpu.core_type = #tpu.core_type<tc>, window_params = [{transform_indices = @transform_0, window_bounds = array<i64: 16, 128>}, {pipeline_mode = #tpu.pipeline_mode<synchronous>, transform_indices = @transform_1, window_bounds = array<i64: 1, 128>}, {pipeline_mode = #tpu.pipeline_mode<synchronous>, transform_indices = @transform_2, window_bounds = array<i64: 1, 128>}, {pipeline_mode = #tpu.pipeline_mode<synchronous>, transform_indices = @transform_3, window_bounds = array<i64: 128, 128>}, {pipeline_mode = #tpu.pipeline_mode<synchronous>, transform_indices = @transform_4, window_bounds = array<i64: 1, 128>}, {pipeline_mode = #tpu.pipeline_mode<synchronous>, transform_indices = @transform_5, window_bounds = array<i64: 128, 128>}, {pipeline_mode = #tpu.pipeline_mode<synchronous>, transform_indices = @transform_6, window_bounds = array<i64: 1, 128>}, {transform_indices = @transform_7, window_bounds = array<i64: 16, 128>}]} {
    %c0 = arith.constant 0 : index
    %c0_0 = arith.constant 0 : index
    %0 = vector.load %arg1[%c0, %c0_0] : memref<16x128xf32, #tpu.memory_space<vmem>>, vector<16x128xf32>
    %cst = arith.constant dense<0.000000e+00> : vector<16xf32>
    %1 = vector.multi_reduction <add>, %0, %cst [1] : vector<16x128xf32> to vector<16xf32>
    %2 = vector.shape_cast %1 : vector<16xf32> to vector<16x1xf32>
    %cst_1 = arith.constant 1.280000e+02 : f32
    %3 = vector.broadcast %cst_1 : f32 to vector<16x1xf32>
    %4 = arith.divf %2, %3 : vector<16x1xf32>
    %5 = vector.broadcast %4 : vector<16x1xf32> to vector<16x128xf32>
    %6 = arith.subf %0, %5 : vector<16x128xf32>
    %7 = arith.mulf %6, %6 : vector<16x128xf32>
    %cst_2 = arith.constant dense<0.000000e+00> : vector<16xf32>
    %8 = vector.multi_reduction <add>, %7, %cst_2 [1] : vector<16x128xf32> to vector<16xf32>
    %9 = vector.shape_cast %8 : vector<16xf32> to vector<16x1xf32>
    %cst_3 = arith.constant 1.280000e+02 : f32
    %10 = vector.broadcast %cst_3 : f32 to vector<16x1xf32>
    %11 = arith.divf %9, %10 : vector<16x1xf32>
    %cst_4 = arith.constant 9.99999974E-6 : f32
    %12 = vector.broadcast %cst_4 : f32 to vector<16x1xf32>
    %13 = arith.addf %11, %12 : vector<16x1xf32>
    %14 = math.rsqrt %13 : vector<16x1xf32>
    %15 = vector.broadcast %14 : vector<16x1xf32> to vector<16x128xf32>
    %16 = arith.mulf %6, %15 : vector<16x128xf32>
    %c0_5 = arith.constant 0 : index
    %c0_6 = arith.constant 0 : index
    %17 = vector.load %arg2[%c0_5, %c0_6] : memref<1x128xf32, #tpu.memory_space<vmem>>, vector<1x128xf32>
    %18 = vector.broadcast %17 : vector<1x128xf32> to vector<16x128xf32>
    %19 = arith.mulf %16, %18 : vector<16x128xf32>
    %c0_7 = arith.constant 0 : index
    %c0_8 = arith.constant 0 : index
    %20 = vector.load %arg3[%c0_7, %c0_8] : memref<1x128xf32, #tpu.memory_space<vmem>>, vector<1x128xf32>
    %21 = vector.broadcast %20 : vector<1x128xf32> to vector<16x128xf32>
    %22 = arith.addf %19, %21 : vector<16x128xf32>
    %23 = arith.truncf %22 : vector<16x128xf32> to vector<16x128xbf16>
    %c0_9 = arith.constant 0 : index
    %c0_10 = arith.constant 0 : index
    %24 = vector.load %arg4[%c0_9, %c0_10] : memref<128x128xbf16, #tpu.memory_space<vmem>>, vector<128x128xbf16>
    %cst_11 = arith.constant dense<0.000000e+00> : vector<16x128xf32>
    %25 = tpu.matmul %23, %24, %cst_11 {dimension_numbers = #tpu.dot_dimension_numbers<[1], [0], [0], [1], [0, 0, 1, 1], [], []>} : vector<16x128xbf16>, vector<128x128xbf16>, vector<16x128xf32> -> vector<16x128xf32>
    %c0_12 = arith.constant 0 : index
    %c0_13 = arith.constant 0 : index
    %26 = vector.load %arg5[%c0_12, %c0_13] : memref<1x128xf32, #tpu.memory_space<vmem>>, vector<1x128xf32>
    %27 = vector.broadcast %26 : vector<1x128xf32> to vector<16x128xf32>
    %28 = arith.addf %25, %27 : vector<16x128xf32>
    %cst_14 = arith.constant 5.000000e-01 : f32
    %29 = vector.broadcast %cst_14 : f32 to vector<16x128xf32>
    %30 = arith.mulf %29, %28 : vector<16x128xf32>
    %cst_15 = arith.constant 0.707106769 : f32
    %31 = vector.broadcast %cst_15 : f32 to vector<16x128xf32>
    %32 = arith.mulf %28, %31 : vector<16x128xf32>
    %33 = math.erf %32 : vector<16x128xf32>
    %cst_16 = arith.constant 1.000000e+00 : f32
    %34 = vector.broadcast %cst_16 : f32 to vector<16x128xf32>
    %35 = arith.addf %34, %33 : vector<16x128xf32>
    %36 = arith.mulf %30, %35 : vector<16x128xf32>
    %37 = arith.truncf %36 : vector<16x128xf32> to vector<16x128xbf16>
    %c0_17 = arith.constant 0 : index
    %c0_18 = arith.constant 0 : index
    %38 = vector.load %arg6[%c0_17, %c0_18] : memref<128x128xbf16, #tpu.memory_space<vmem>>, vector<128x128xbf16>
    %cst_19 = arith.constant dense<0.000000e+00> : vector<16x128xf32>
    %39 = tpu.matmul %37, %38, %cst_19 {dimension_numbers = #tpu.dot_dimension_numbers<[1], [0], [0], [1], [0, 0, 1, 1], [], []>} : vector<16x128xbf16>, vector<128x128xbf16>, vector<16x128xf32> -> vector<16x128xf32>
    %c0_20 = arith.constant 0 : index
    %c0_21 = arith.constant 0 : index
    %40 = vector.load %arg7[%c0_20, %c0_21] : memref<1x128xf32, #tpu.memory_space<vmem>>, vector<1x128xf32>
    %41 = vector.broadcast %40 : vector<1x128xf32> to vector<16x128xf32>
    %42 = arith.addf %39, %41 : vector<16x128xf32>
    %43 = arith.addf %22, %42 : vector<16x128xf32>
    %c0_22 = arith.constant 0 : index
    %c0_23 = arith.constant 0 : index
    %44 = vector.load %arg8[%c0_22, %c0_23] : memref<16x128xf32, #tpu.memory_space<vmem>>, vector<16x128xf32>
    tpu.vector_store %arg8[%c0_22, %c0_23], %43 {strides = array<i32>} : memref<16x128xf32, #tpu.memory_space<vmem>>, vector<16x128xf32>,
    return
  }
  func.func @transform_0(%arg0: i32) -> (i32, i32) {
    %c0_i32 = arith.constant 0 : i32
    %c0_i32_0 = arith.constant 0 : i32
    return %arg0, %c0_i32 : i32, i32
  }
  func.func @transform_1(%arg0: i32) -> (i32, i32) {
    %c0_i32 = arith.constant 0 : i32
    %c0_i32_0 = arith.constant 0 : i32
    %c0_i32_1 = arith.constant 0 : i32
    return %c0_i32, %c0_i32_0 : i32, i32
  }
  func.func @transform_2(%arg0: i32) -> (i32, i32) {
    %c0_i32 = arith.constant 0 : i32
    %c0_i32_0 = arith.constant 0 : i32
    %c0_i32_1 = arith.constant 0 : i32
    return %c0_i32, %c0_i32_0 : i32, i32
  }
  func.func @transform_3(%arg0: i32) -> (i32, i32) {
    %c0_i32 = arith.constant 0 : i32
    %c0_i32_0 = arith.constant 0 : i32
    %c0_i32_1 = arith.constant 0 : i32
    return %c0_i32, %c0_i32_0 : i32, i32
  }
  func.func @transform_4(%arg0: i32) -> (i32, i32) {
    %c0_i32 = arith.constant 0 : i32
    %c0_i32_0 = arith.constant 0 : i32
    %c0_i32_1 = arith.constant 0 : i32
    return %c0_i32, %c0_i32_0 : i32, i32
  }
  func.func @transform_5(%arg0: i32) -> (i32, i32) {
    %c0_i32 = arith.constant 0 : i32
    %c0_i32_0 = arith.constant 0 : i32
    %c0_i32_1 = arith.constant 0 : i32
    return %c0_i32, %c0_i32_0 : i32, i32
  }
  func.func @transform_6(%arg0: i32) -> (i32, i32) {
    %c0_i32 = arith.constant 0 : i32
    %c0_i32_0 = arith.constant 0 : i32
    %c0_i32_1 = arith.constant 0 : i32
    return %c0_i32, %c0_i32_0 : i32, i32
  }
  func.func @transform_7(%arg0: i32) -> (i32, i32) {
    %c0_i32 = arith.constant 0 : i32
    %c0_i32_0 = arith.constant 0 : i32
    return %arg0, %c0_i32 : i32, i32
  }
}

</mosaic_0001>

<bundles_post_ra>
// kernel: tpu_custom_call.1
= control target key start
LH: loop header
LB: loop body
LE: loop exit
PB: predicated region body
PF: predicated region fallthrough
CT: control target
= control target key end

     0   :  { %12 = vsyncpa [#allocation3], 0  ;;  %s716_s0 = inlined_call_operand.hbm [shape: f32[16,128], index: 0, kind: input, shape index: {}]   ;;  %s717_s1 = inlined_call_operand.vmem [shape: f32[1,128], index: 1, kind: input, shape index: {}]   ;;  %s718_s2 = inlined_call_operand.vmem [shape: f32[1,128], index: 2, kind: input, shape index: {}]   ;;  %s719_s3 = inlined_call_operand.hbm [shape: bf16[128,128], index: 3, kind: input, shape index: {}]   ;;  %s720_s4 = inlined_call_operand.vmem [shape: f32[1,128], index: 4, kind: input, shape index: {}]   ;;  %s721_s5 = inlined_call_operand.hbm [shape: bf16[128,128], index: 5, kind: input, shape index: {}]   ;;  %s722_s6 = inlined_call_operand.vmem [shape: f32[1,128], index: 6, kind: input, shape index: {}]   ;;  %s723_s7 = inlined_call_operand.hbm [shape: f32[16,128], index: 7, kind: output, shape index: {}]  }
   0x1   :  { %13 = vsyncpa [#allocation6], 0 }
   0x2   :  { %14 = vsyncpa [#allocation4], 0  ;;  %s576_s24 = smov [#allocation5]   ;;  %s482_s28 = scalar_lea.hbm %s719_s3, 1024 }
   0x3   :  { %s36_s25 = sshll.u32 %s576_s24, 4  ;;  %p483_p0 = scmp.ne.s32.totalorder %s719_s3, %s482_s28  ;;  %s37_s25 = int_to_ptr.vmem [resolvable:$true] %s36_s25 }
   0x4   :  { %p486_p1 = scmp.lt.u32.totalorder %s482_s28, %s719_s3 }
   0x6   :  { %p488_p2 = pnand %p486_p1, %p483_p0 }
   0x8   :  { %491 = shalt.err (!%p488_p2)
}
   0x9   :  { %s492_s10 = scalar_lea.vmem %s37_s25, 1024  ;;  %p497_p4 = scmp.lt.s32.totalorder %s37_s25, %s37_s25 }
   0xa   :  { %p493_p3 = scmp.ne.s32.totalorder %s37_s25, %s492_s10  ;;  %p498_p5 = scmp.lt.s32.totalorder %s492_s10, %s492_s10 }
   0xc   :  { %p499_p6 = por %p498_p5, %p497_p4 }
   0xe   :  { %p500_p7 = pnand %p499_p6, %p493_p3 }
  0x10   :  { %503 = shalt.err (!%p500_p7)
}
  0x11   :  { %s577_s11 = smov 64   ;;  %s578_s12 = smov 4  }
  0x12   :  { %42 = dma.hbm_to_vmem [thread:$0]  %s719_s3, 1024, %s37_s25, [#allocation6], %s577_s11, %s577_s11, %s578_s12  }
  0x13   :  { %s579_s15 = smov [#allocation2]   ;;  %s504_s19 = scalar_lea.hbm %s716_s0, 256 }
  0x14   :  { %s20_s16 = sshll.u32 %s579_s15, 4  ;;  %p505_p8 = scmp.ne.s32.totalorder %s716_s0, %s504_s19  ;;  %s21_s16 = int_to_ptr.vmem [resolvable:$true] %s20_s16 }
  0x15   :  { %p508_p9 = scmp.lt.u32.totalorder %s504_s19, %s716_s0 }
  0x17   :  { %p510_p10 = pnand %p508_p9, %p505_p8 }
  0x19   :  { %513 = shalt.err (!%p510_p10)
}
  0x1a   :  { %s514_s24 = scalar_lea.vmem %s21_s16, 256  ;;  %p519_p12 = scmp.lt.s32.totalorder %s21_s16, %s21_s16 }
  0x1b   :  { %p515_p11 = scmp.ne.s32.totalorder %s21_s16, %s514_s24  ;;  %p520_p13 = scmp.lt.s32.totalorder %s514_s24, %s514_s24 }
  0x1d   :  { %p521_p0 = por %p520_p13, %p519_p12 }
  0x1f   :  { %p522_p1 = pnand %p521_p0, %p515_p11 }
  0x21   :  { %525 = shalt.err (!%p522_p1)
}
  0x22   :  { %s580_s3 = smov 128   ;;  %s581_s25 = smov 8  }
  0x23   :  { %26 = dma.hbm_to_vmem [thread:$0]  %s716_s0, 256, %s21_s16, [#allocation3], %s580_s3, %s580_s3, %s581_s25  }
  0x24   :  { %s582_s28 = smov [#allocation7]   ;;  %s526_s9 = scalar_lea.hbm %s721_s5, 1024 }
  0x25   :  { %s50_s29 = sshll.u32 %s582_s28, 4  ;;  %p527_p2 = scmp.ne.s32.totalorder %s721_s5, %s526_s9  ;;  %s51_s29 = int_to_ptr.vmem [resolvable:$true] %s50_s29 }
  0x26   :  { %p530_p3 = scmp.lt.u32.totalorder %s526_s9, %s721_s5 }
  0x28   :  { %p532_p4 = pnand %p530_p3, %p527_p2 }
  0x2a   :  { %535 = shalt.err (!%p532_p4)
}
  0x2b   :  { %s536_s17 = scalar_lea.vmem %s51_s29, 1024  ;;  %p541_p6 = scmp.lt.s32.totalorder %s51_s29, %s51_s29 }
  0x2c   :  { %p537_p5 = scmp.ne.s32.totalorder %s51_s29, %s536_s17  ;;  %p542_p7 = scmp.lt.s32.totalorder %s536_s17, %s536_s17 }
  0x2e   :  { %p543_p8 = por %p542_p7, %p541_p6 }
  0x30   :  { %p544_p9 = pnand %p543_p8, %p537_p5 }
  0x32   :  { %547 = shalt.err (!%p544_p9)
}
  0x33   :  { %56 = dma.hbm_to_vmem [thread:$0]  %s721_s5, 1024, %s51_s29, [#allocation6], %s577_s11, %s577_s11, %s578_s12  }
  0x34   :  { %570 = dma.done.wait [#allocation3], 256  }
  0x35   :  { %571 = vsyncadd [#allocation3], 4294967040 }
  0x36   :  { %572 = dma.done.wait [#allocation6], 2048  }
  0x37   :  { %573 = vsyncadd [#allocation6], 4294965248  ;;  %v69_v0 = vld [vmem:[#allocation2] sm:$0xff]  ;;  %v70_v1 = vld [vmem:[#allocation2 + $0x8] sm:$0xff]  ;;  %v583_v3 = vmov 0.0   ;;  %vm584_vm0 = vmmov 0  }
  0x38   :  { %71 = vadd.xlane.f32.xlu0 %v69_v0  ;;  %v458_v2 = vld [vmem:[#allocation5] sm:$0xff]   ;;  %408 = vmatprep.subr.bf16.mxu0 %v583_v3  ;;  %v459_v12 = vld [vmem:[#allocation5 + $0x8] sm:$0xff]   ;;  %v460_v13 = vld [vmem:[#allocation5 + $0x10] sm:$0xff]   ;;  %s585_s20 = smov [#allocation8]  }
  0x39   :  { %428 = vmatprep.subr.bf16.mxu1 %v583_v3  ;;  %409 = vmatpush3.bf16.msra.mxu0 %v458_v2  ;;  %v461_v14 = vld [vmem:[#allocation5 + $0x18] sm:$0xff]   ;;  %v462_v15 = vld [vmem:[#allocation5 + $0x20] sm:$0xff]   ;;  %v463_v16 = vld [vmem:[#allocation5 + $0x28] sm:$0xff]   ;;  %s357_s21 = sshll.u32 %s585_s20, 4  ;;  %s358_s21 = int_to_ptr.vmem [resolvable:$true] %s357_s21 }
  0x3a   :  { %410 = vmatprep.subr.bf16.mxu0 %v583_v3  ;;  %424 = vmatprep.mubr.msk.bf16.mxu0 %vm584_vm0, %v583_v3  ;;  %v464_v17 = vld [vmem:[#allocation5 + $0x30] sm:$0xff]   ;;  %v465_v18 = vld [vmem:[#allocation5 + $0x38] sm:$0xff]   ;;  %v466_v19 = vld [vmem:[#allocation7] sm:$0xff]   ;;  %s548_s22 = scalar_lea.vmem %s358_s21, 256  ;;  %p553_p11 = scmp.lt.s32.totalorder %s358_s21, %s358_s21 }
  0x3b   :  { %444 = vmatprep.mubr.msk.bf16.mxu1 %vm584_vm0, %v583_v3  ;;  %429 = vmatpush3.bf16.msra.mxu1 %v466_v19  ;;  %v467_v20 = vld [vmem:[#allocation7 + $0x8] sm:$0xff]   ;;  %v370_v29 = vld [vmem:[%s717_s1] ss:$0 sm:$0xff]  ;;  %v469_v39 = vld [vmem:[#allocation7 + $0x18] sm:$0xff]   ;;  %p549_p10 = scmp.ne.s32.totalorder %s358_s21, %s548_s22  ;;  %p554_p12 = scmp.lt.s32.totalorder %s548_s22, %s548_s22 }
  0x3c   :  { %73 = vadd.xlane.f32.xlu0 %v70_v1  ;;  %430 = vmatprep.subr.bf16.mxu1 %v583_v3  ;;  %v371_v33 = vld [vmem:[%s718_s2] ss:$0 sm:$0xff]  ;;  %v470_v40 = vld [vmem:[#allocation7 + $0x20] sm:$0xff]   ;;  %v471_v41 = vld [vmem:[#allocation7 + $0x28] sm:$0xff]  }
  0x3d   :  { %411 = vmatpush3.bf16.msra.mxu0 %v459_v12  ;;  %v468_v38 = vld [vmem:[#allocation7 + $0x10] sm:$0xff]   ;;  %v473_v43 = vld [vmem:[#allocation7 + $0x38] sm:$0xff]   ;;  %p555_p13 = por %p554_p12, %p553_p11 }
  0x3e   :  { %412 = vmatprep.subr.bf16.mxu0 %v583_v3  ;;  %v472_v42 = vld [vmem:[#allocation7 + $0x30] sm:$0xff]  }
  0x3f   :  { %431 = vmatpush3.bf16.msra.mxu1 %v467_v20  ;;  %v372_v44 = vld [vmem:[%s720_s4] ss:$0 sm:$0xff]  ;;  %p556_p0 = pnand %p555_p13, %p549_p10 }
  0x40   :  { %432 = vmatprep.subr.bf16.mxu1 %v583_v3  ;;  %v381_v62 = vld [vmem:[%s722_s6] ss:$0 sm:$0xff] }
  0x41   :  { %413 = vmatpush3.bf16.msra.mxu0 %v460_v13 }
  0x42   :  { %414 = vmatprep.subr.bf16.mxu0 %v583_v3 }
  0x43   :  { %433 = vmatpush3.bf16.msra.mxu1 %v468_v38 }
  0x44   :  { %434 = vmatprep.subr.bf16.mxu1 %v583_v3 }
  0x45   :  { %415 = vmatpush3.bf16.msra.mxu0 %v461_v14 }
  0x46   :  { %416 = vmatprep.subr.bf16.mxu0 %v583_v3 }
  0x47   :  { %435 = vmatpush3.bf16.msra.mxu1 %v469_v39 }
  0x48   :  { %436 = vmatprep.subr.bf16.mxu1 %v583_v3 }
  0x49   :  { %417 = vmatpush3.bf16.msra.mxu0 %v462_v15 }
  0x4a   :  { %418 = vmatprep.subr.bf16.mxu0 %v583_v3 }
  0x4b   :  { %437 = vmatpush3.bf16.msra.mxu1 %v470_v40 }
  0x4c   :  { %438 = vmatprep.subr.bf16.mxu1 %v583_v3 }
  0x4d   :  { %419 = vmatpush3.bf16.msra.mxu0 %v463_v16 }
  0x4e   :  { %420 = vmatprep.subr.bf16.mxu0 %v583_v3 }
  0x4f   :  { %439 = vmatpush3.bf16.msra.mxu1 %v471_v41 }
  0x50   :  { %440 = vmatprep.subr.bf16.mxu1 %v583_v3 }
  0x51   :  { %421 = vmatpush3.bf16.msra.mxu0 %v464_v17 }
  0x52   :  { %422 = vmatprep.subr.bf16.mxu0 %v583_v3 }
  0x53   :  { %441 = vmatpush3.bf16.msra.mxu1 %v472_v42 }
  0x54   :  { %442 = vmatprep.subr.bf16.mxu1 %v583_v3 }
  0x55   :  { %423 = vmatpush3.bf16.msra.mxu0 %v465_v18 }
  0x57   :  { %443 = vmatpush3.bf16.msra.mxu1 %v473_v43 }
  0xc5   :  { %v72_v4 = vpop.xlane.xlu0 %71 }
  0xc6   :  { %v76_v5 = vmul.f32 0.0078125, %v72_v4 }
  0xc8   :  { %v78_v6 = vsub.f32 %v69_v0, %v76_v5 }
  0xc9   :  { %v74_v7 = vpop.xlane.xlu0 %73 }
  0xca   :  { %v77_v8 = vmul.f32 0.0078125, %v74_v7  ;;  %v80_v9 = vmul.f32 %v78_v6, %v78_v6 }
  0xcc   :  { %v79_v10 = vsub.f32 %v70_v1, %v77_v8  ;;  %82 = vadd.xlane.f32.xlu1 %v80_v9 }
  0xce   :  { %v81_v11 = vmul.f32 %v79_v10, %v79_v10 }
  0xd0   :  { %84 = vadd.xlane.f32.xlu1 %v81_v11 }
 0x159   :  { %v83_v21 = vpop.xlane.xlu1 %82 }
 0x15a   :  { %v86_v22 = vmul.f32 0.0078125, %v83_v21 }
 0x15c   :  { %v88_v23 = vadd.f32 1e-05, %v86_v22 }
 0x15d   :  { %v85_v24 = vpop.xlane.xlu1 %84 }
 0x15e   :  { %474 = vrsqrt.f32 %v88_v23  ;;  %v87_v25 = vmul.f32 0.0078125, %v85_v24 }
 0x160   :  { %v89_v26 = vadd.f32 1e-05, %v87_v25 }
 0x162   :  { %476 = vrsqrt.f32 %v89_v26 }
 0x168   :  { %v475_v27 = vpop.eup %474 }
 0x169   :  { %v92_v28 = vmul.f32 %v475_v27, %v78_v6 }
 0x16b   :  { %v101_v32 = vmul.f32 %v370_v29, %v92_v28 }
 0x16c   :  { %v477_v30 = vpop.eup %476 }
 0x16d   :  { %v93_v31 = vmul.f32 %v477_v30, %v79_v10  ;;  %v110_v35 = vadd.f32 %v371_v33, %v101_v32 }
 0x16f   :  { %v102_v34 = vmul.f32 %v370_v29, %v93_v31 }
 0x171   :  { %v111_v36 = vadd.f32 %v371_v33, %v102_v34 }
 0x173   :  { %v112_v37 = vpack.c.bf16 %v111_v36, %v110_v35 }
 0x175   :  { %425 = vmatmul.mubr.bf16.vlgmr.msra.gmra.mrb[0].mxu0 %v112_v37 }
 0x248   :  { %v218_v45 = vpop.f32.mrb[0].mxu0 }
 0x249   :  { %v219_v46 = vadd.f32 %v372_v44, %v218_v45  ;;  %v426_v47 = vpop.f32.mrb[1].mxu0 }
 0x24a   :  { %v221_v48 = vpop.f32.mrb[2].mxu0 }
 0x24b   :  { %v227_v49 = vmul.f32 0.70710677, %v219_v46  ;;  %v222_v50 = vadd.f32 %v372_v44, %v221_v48  ;;  %v427_v51 = vpop.f32.mrb[3].mxu0  ;;  %v225_v56 = vmul.f32 0.5, %v219_v46 }
 0x24d   :  { %478 = verf.f32 %v227_v49  ;;  %v228_v52 = vmul.f32 0.70710677, %v222_v50  ;;  %v226_v57 = vmul.f32 0.5, %v222_v50 }
 0x24f   :  { %480 = verf.f32 %v228_v52 }
 0x257   :  { %v479_v53 = vpop.eup %478 }
 0x258   :  { %v231_v54 = vadd.f32 1.0, %v479_v53 }
 0x259   :  { %v481_v55 = vpop.eup %480 }
 0x25a   :  { %v232_v58 = vadd.f32 1.0, %v481_v55  ;;  %v233_v59 = vmul.f32 %v231_v54, %v225_v56 }
 0x25c   :  { %v234_v60 = vmul.f32 %v232_v58, %v226_v57 }
 0x25e   :  { %v235_v61 = vpack.c.bf16 %v234_v60, %v233_v59 }
 0x260   :  { %445 = vmatmul.mubr.bf16.vlgmr.msra.gmra.mrb[0].mxu1 %v235_v61 }
 0x333   :  { %v341_v63 = vpop.f32.mrb[0].mxu1 }
 0x334   :  { %v342_v0 = vadd.f32 %v381_v62, %v341_v63  ;;  %v446_v1 = vpop.f32.mrb[1].mxu1 }
 0x335   :  { %v344_v2 = vpop.f32.mrb[2].mxu1 }
 0x336   :  { %v348_v3 = vadd.f32 %v342_v0, %v110_v35  ;;  %v345_v4 = vadd.f32 %v381_v62, %v344_v2  ;;  %v447_v5 = vpop.f32.mrb[3].mxu1 }
 0x338   :  { %350 = vst [vmem:[#allocation8] sm:$0xff] %v348_v3  ;;  %v349_v6 = vadd.f32 %v345_v4, %v111_v36 }
 0x33a   :  { %351 = vst [vmem:[#allocation8 + $0x8] sm:$0xff] %v349_v6 }
 0x33b   :  { %559 = shalt.err (!%p556_p0)
}
 0x33c   :  { %s560_s24 = scalar_lea.hbm %s723_s7, 256 }
 0x33d   :  { %p561_p1 = scmp.ne.s32.totalorder %s723_s7, %s560_s24  ;;  %p564_p2 = scmp.lt.u32.totalorder %s560_s24, %s723_s7 }
 0x33f   :  { %p566_p3 = pnand %p564_p2, %p561_p1 }
 0x341   :  { %569 = shalt.err (!%p566_p3)
}
 0x342   :  { %363 = dma.vmem_to_hbm [thread:$0]  %s358_s21, 256, %s723_s7, [#allocation4], %s580_s3, %s580_s3, %s581_s25  }
 0x343   :  { %574 = dma.done.wait [#allocation4], 256  }
 0x344   :  { %575 = vsyncadd [#allocation4], 4294967040 }
 0x345   :  { %367 = vsyncpa [#allocation3], 1 }
 0x346   :  { %368 = vsyncpa [#allocation6], 1 }
 0x347   :  { %369 = vsyncpa [#allocation4], 1 }

// kernel: tpu_custom_call.1
= control target key start
LH: loop header
LB: loop body
LE: loop exit
PB: predicated region body
PF: predicated region fallthrough
CT: control target
= control target key end

     0   :  { %12 = vsyncpa [#allocation3], 0  ;;  %s716_s0 = inlined_call_operand.hbm [shape: f32[16,128], index: 0, kind: input, shape index: {}]   ;;  %s717_s1 = inlined_call_operand.vmem [shape: f32[1,128], index: 1, kind: input, shape index: {}]   ;;  %s718_s2 = inlined_call_operand.vmem [shape: f32[1,128], index: 2, kind: input, shape index: {}]   ;;  %s719_s3 = inlined_call_operand.hbm [shape: bf16[128,128], index: 3, kind: input, shape index: {}]   ;;  %s720_s4 = inlined_call_operand.vmem [shape: f32[1,128], index: 4, kind: input, shape index: {}]   ;;  %s721_s5 = inlined_call_operand.hbm [shape: bf16[128,128], index: 5, kind: input, shape index: {}]   ;;  %s722_s6 = inlined_call_operand.vmem [shape: f32[1,128], index: 6, kind: input, shape index: {}]   ;;  %s723_s7 = inlined_call_operand.hbm [shape: f32[16,128], index: 7, kind: output, shape index: {}]  }
   0x1   :  { %13 = vsyncpa [#allocation6], 0 }
   0x2   :  { %14 = vsyncpa [#allocation4], 0  ;;  %s576_s24 = smov [#allocation5]   ;;  %s482_s28 = scalar_lea.hbm %s719_s3, 1024 }
   0x3   :  { %s36_s25 = sshll.u32 %s576_s24, 4  ;;  %p483_p0 = scmp.ne.s32.totalorder %s719_s3, %s482_s28  ;;  %s37_s25 = int_to_ptr.vmem [resolvable:$true] %s36_s25 }
   0x4   :  { %p486_p1 = scmp.lt.u32.totalorder %s482_s28, %s719_s3 }
   0x6   :  { %p488_p2 = pnand %p486_p1, %p483_p0 }
   0x8   :  { %491 = shalt.err (!%p488_p2)
}
   0x9   :  { %s492_s10 = scalar_lea.vmem %s37_s25, 1024  ;;  %p497_p4 = scmp.lt.s32.totalorder %s37_s25, %s37_s25 }
   0xa   :  { %p493_p3 = scmp.ne.s32.totalorder %s37_s25, %s492_s10  ;;  %p498_p5 = scmp.lt.s32.totalorder %s492_s10, %s492_s10 }
   0xc   :  { %p499_p6 = por %p498_p5, %p497_p4 }
   0xe   :  { %p500_p7 = pnand %p499_p6, %p493_p3 }
  0x10   :  { %503 = shalt.err (!%p500_p7)
}
  0x11   :  { %s577_s11 = smov 64   ;;  %s578_s12 = smov 4  }
  0x12   :  { %42 = dma.hbm_to_vmem [thread:$0]  %s719_s3, 1024, %s37_s25, [#allocation6], %s577_s11, %s577_s11, %s578_s12  }
  0x13   :  { %s579_s15 = smov [#allocation2]   ;;  %s504_s19 = scalar_lea.hbm %s716_s0, 256 }
  0x14   :  { %s20_s16 = sshll.u32 %s579_s15, 4  ;;  %p505_p8 = scmp.ne.s32.totalorder %s716_s0, %s504_s19  ;;  %s21_s16 = int_to_ptr.vmem [resolvable:$true] %s20_s16 }
  0x15   :  { %p508_p9 = scmp.lt.u32.totalorder %s504_s19, %s716_s0 }
  0x17   :  { %p510_p10 = pnand %p508_p9, %p505_p8 }
  0x19   :  { %513 = shalt.err (!%p510_p10)
}
  0x1a   :  { %s514_s24 = scalar_lea.vmem %s21_s16, 256  ;;  %p519_p12 = scmp.lt.s32.totalorder %s21_s16, %s21_s16 }
  0x1b   :  { %p515_p11 = scmp.ne.s32.totalorder %s21_s16, %s514_s24  ;;  %p520_p13 = scmp.lt.s32.totalorder %s514_s24, %s514_s24 }
  0x1d   :  { %p521_p0 = por %p520_p13, %p519_p12 }
  0x1f   :  { %p522_p1 = pnand %p521_p0, %p515_p11 }
  0x21   :  { %525 = shalt.err (!%p522_p1)
}
  0x22   :  { %s580_s3 = smov 128   ;;  %s581_s25 = smov 8  }
  0x23   :  { %26 = dma.hbm_to_vmem [thread:$0]  %s716_s0, 256, %s21_s16, [#allocation3], %s580_s3, %s580_s3, %s581_s25  }
  0x24   :  { %s582_s28 = smov [#allocation7]   ;;  %s526_s9 = scalar_lea.hbm %s721_s5, 1024 }
  0x25   :  { %s50_s29 = sshll.u32 %s582_s28, 4  ;;  %p527_p2 = scmp.ne.s32.totalorder %s721_s5, %s526_s9  ;;  %s51_s29 = int_to_ptr.vmem [resolvable:$true] %s50_s29 }
  0x26   :  { %p530_p3 = scmp.lt.u32.totalorder %s526_s9, %s721_s5 }
  0x28   :  { %p532_p4 = pnand %p530_p3, %p527_p2 }
  0x2a   :  { %535 = shalt.err (!%p532_p4)
}
  0x2b   :  { %s536_s17 = scalar_lea.vmem %s51_s29, 1024  ;;  %p541_p6 = scmp.lt.s32.totalorder %s51_s29, %s51_s29 }
  0x2c   :  { %p537_p5 = scmp.ne.s32.totalorder %s51_s29, %s536_s17  ;;  %p542_p7 = scmp.lt.s32.totalorder %s536_s17, %s536_s17 }
  0x2e   :  { %p543_p8 = por %p542_p7, %p541_p6 }
  0x30   :  { %p544_p9 = pnand %p543_p8, %p537_p5 }
  0x32   :  { %547 = shalt.err (!%p544_p9)
}
  0x33   :  { %56 = dma.hbm_to_vmem [thread:$0]  %s721_s5, 1024, %s51_s29, [#allocation6], %s577_s11, %s577_s11, %s578_s12  }
  0x34   :  { %570 = dma.done.wait [#allocation3], 256  }
  0x35   :  { %571 = vsyncadd [#allocation3], 4294967040 }
  0x36   :  { %572 = dma.done.wait [#allocation6], 2048  }
  0x37   :  { %573 = vsyncadd [#allocation6], 4294965248  ;;  %v69_v0 = vld [vmem:[#allocation2] sm:$0xff]  ;;  %v70_v1 = vld [vmem:[#allocation2 + $0x8] sm:$0xff]  ;;  %v583_v3 = vmov 0.0   ;;  %vm584_vm0 = vmmov 0  }
  0x38   :  { %71 = vadd.xlane.f32.xlu0 %v69_v0  ;;  %v458_v2 = vld [vmem:[#allocation5] sm:$0xff]   ;;  %408 = vmatprep.subr.bf16.mxu0 %v583_v3  ;;  %v459_v12 = vld [vmem:[#allocation5 + $0x8] sm:$0xff]   ;;  %v460_v13 = vld [vmem:[#allocation5 + $0x10] sm:$0xff]   ;;  %s585_s20 = smov [#allocation8]  }
  0x39   :  { %428 = vmatprep.subr.bf16.mxu1 %v583_v3  ;;  %409 = vmatpush3.bf16.msra.mxu0 %v458_v2  ;;  %v461_v14 = vld [vmem:[#allocation5 + $0x18] sm:$0xff]   ;;  %v462_v15 = vld [vmem:[#allocation5 + $0x20] sm:$0xff]   ;;  %v463_v16 = vld [vmem:[#allocation5 + $0x28] sm:$0xff]   ;;  %s357_s21 = sshll.u32 %s585_s20, 4  ;;  %s358_s21 = int_to_ptr.vmem [resolvable:$true] %s357_s21 }
  0x3a   :  { %410 = vmatprep.subr.bf16.mxu0 %v583_v3  ;;  %424 = vmatprep.mubr.msk.bf16.mxu0 %vm584_vm0, %v583_v3  ;;  %v464_v17 = vld [vmem:[#allocation5 + $0x30] sm:$0xff]   ;;  %v465_v18 = vld [vmem:[#allocation5 + $0x38] sm:$0xff]   ;;  %v466_v19 = vld [vmem:[#allocation7] sm:$0xff]   ;;  %s548_s22 = scalar_lea.vmem %s358_s21, 256  ;;  %p553_p11 = scmp.lt.s32.totalorder %s358_s21, %s358_s21 }
  0x3b   :  { %444 = vmatprep.mubr.msk.bf16.mxu1 %vm584_vm0, %v583_v3  ;;  %429 = vmatpush3.bf16.msra.mxu1 %v466_v19  ;;  %v467_v20 = vld [vmem:[#allocation7 + $0x8] sm:$0xff]   ;;  %v370_v29 = vld [vmem:[%s717_s1] ss:$0 sm:$0xff]  ;;  %v469_v39 = vld [vmem:[#allocation7 + $0x18] sm:$0xff]   ;;  %p549_p10 = scmp.ne.s32.totalorder %s358_s21, %s548_s22  ;;  %p554_p12 = scmp.lt.s32.totalorder %s548_s22, %s548_s22 }
  0x3c   :  { %73 = vadd.xlane.f32.xlu0 %v70_v1  ;;  %430 = vmatprep.subr.bf16.mxu1 %v583_v3  ;;  %v371_v33 = vld [vmem:[%s718_s2] ss:$0 sm:$0xff]  ;;  %v470_v40 = vld [vmem:[#allocation7 + $0x20] sm:$0xff]   ;;  %v471_v41 = vld [vmem:[#allocation7 + $0x28] sm:$0xff]  }
  0x3d   :  { %411 = vmatpush3.bf16.msra.mxu0 %v459_v12  ;;  %v468_v38 = vld [vmem:[#allocation7 + $0x10] sm:$0xff]   ;;  %v473_v43 = vld [vmem:[#allocation7 + $0x38] sm:$0xff]   ;;  %p555_p13 = por %p554_p12, %p553_p11 }
  0x3e   :  { %412 = vmatprep.subr.bf16.mxu0 %v583_v3  ;;  %v472_v42 = vld [vmem:[#allocation7 + $0x30] sm:$0xff]  }
  0x3f   :  { %431 = vmatpush3.bf16.msra.mxu1 %v467_v20  ;;  %v372_v44 = vld [vmem:[%s720_s4] ss:$0 sm:$0xff]  ;;  %p556_p0 = pnand %p555_p13, %p549_p10 }
  0x40   :  { %432 = vmatprep.subr.bf16.mxu1 %v583_v3  ;;  %v381_v62 = vld [vmem:[%s722_s6] ss:$0 sm:$0xff] }
  0x41   :  { %413 = vmatpush3.bf16.msra.mxu0 %v460_v13 }
  0x42   :  { %414 = vmatprep.subr.bf16.mxu0 %v583_v3 }
  0x43   :  { %433 = vmatpush3.bf16.msra.mxu1 %v468_v38 }
  0x44   :  { %434 = vmatprep.subr.bf16.mxu1 %v583_v3 }
  0x45   :  { %415 = vmatpush3.bf16.msra.mxu0 %v461_v14 }
  0x46   :  { %416 = vmatprep.subr.bf16.mxu0 %v583_v3 }
  0x47   :  { %435 = vmatpush3.bf16.msra.mxu1 %v469_v39 }
  0x48   :  { %436 = vmatprep.subr.bf16.mxu1 %v583_v3 }
  0x49   :  { %417 = vmatpush3.bf16.msra.mxu0 %v462_v15 }
  0x4a   :  { %418 = vmatprep.subr.bf16.mxu0 %v583_v3 }
  0x4b   :  { %437 = vmatpush3.bf16.msra.mxu1 %v470_v40 }
  0x4c   :  { %438 = vmatprep.subr.bf16.mxu1 %v583_v3 }
  0x4d   :  { %419 = vmatpush3.bf16.msra.mxu0 %v463_v16 }
  0x4e   :  { %420 = vmatprep.subr.bf16.mxu0 %v583_v3 }
  0x4f   :  { %439 = vmatpush3.bf16.msra.mxu1 %v471_v41 }
  0x50   :  { %440 = vmatprep.subr.bf16.mxu1 %v583_v3 }
  0x51   :  { %421 = vmatpush3.bf16.msra.mxu0 %v464_v17 }
  0x52   :  { %422 = vmatprep.subr.bf16.mxu0 %v583_v3 }
  0x53   :  { %441 = vmatpush3.bf16.msra.mxu1 %v472_v42 }
  0x54   :  { %442 = vmatprep.subr.bf16.mxu1 %v583_v3 }
  0x55   :  { %423 = vmatpush3.bf16.msra.mxu0 %v465_v18 }
  0x57   :  { %443 = vmatpush3.bf16.msra.mxu1 %v473_v43 }
  0xc5   :  { %v72_v4 = vpop.xlane.xlu0 %71 }
  0xc6   :  { %v76_v5 = vmul.f32 0.0078125, %v72_v4 }
  0xc8   :  { %v78_v6 = vsub.f32 %v69_v0, %v76_v5 }
  0xc9   :  { %v74_v7 = vpop.xlane.xlu0 %73 }
  0xca   :  { %v77_v8 = vmul.f32 0.0078125, %v74_v7  ;;  %v80_v9 = vmul.f32 %v78_v6, %v78_v6 }
  0xcc   :  { %v79_v10 = vsub.f32 %v70_v1, %v77_v8  ;;  %82 = vadd.xlane.f32.xlu1 %v80_v9 }
  0xce   :  { %v81_v11 = vmul.f32 %v79_v10, %v79_v10 }
  0xd0   :  { %84 = vadd.xlane.f32.xlu1 %v81_v11 }
 0x159   :  { %v83_v21 = vpop.xlane.xlu1 %82 }
 0x15a   :  { %v86_v22 = vmul.f32 0.0078125, %v83_v21 }
 0x15c   :  { %v88_v23 = vadd.f32 1e-05, %v86_v22 }
 0x15d   :  { %v85_v24 = vpop.xlane.xlu1 %84 }
 0x15e   :  { %474 = vrsqrt.f32 %v88_v23  ;;  %v87_v25 = vmul.f32 0.0078125, %v85_v24 }
 0x160   :  { %v89_v26 = vadd.f32 1e-05, %v87_v25 }
 0x162   :  { %476 = vrsqrt.f32 %v89_v26 }
 0x168   :  { %v475_v27 = vpop.eup %474 }
 0x169   :  { %v92_v28 = vmul.f32 %v475_v27, %v78_v6 }
 0x16b   :  { %v101_v32 = vmul.f32 %v370_v29, %v92_v28 }
 0x16c   :  { %v477_v30 = vpop.eup %476 }
 0x16d   :  { %v93_v31 = vmul.f32 %v477_v30, %v79_v10  ;;  %v110_v35 = vadd.f32 %v371_v33, %v101_v32 }
 0x16f   :  { %v102_v34 = vmul.f32 %v370_v29, %v93_v31 }
 0x171   :  { %v111_v36 = vadd.f32 %v371_v33, %v102_v34 }
 0x173   :  { %v112_v37 = vpack.c.bf16 %v111_v36, %v110_v35 }
 0x175   :  { %425 = vmatmul.mubr.bf16.vlgmr.msra.gmra.mrb[0].mxu0 %v112_v37 }
 0x248   :  { %v218_v45 = vpop.f32.mrb[0].mxu0 }
 0x249   :  { %v219_v46 = vadd.f32 %v372_v44, %v218_v45  ;;  %v426_v47 = vpop.f32.mrb[1].mxu0 }
 0x24a   :  { %v221_v48 = vpop.f32.mrb[2].mxu0 }
 0x24b   :  { %v227_v49 = vmul.f32 0.70710677, %v219_v46  ;;  %v222_v50 = vadd.f32 %v372_v44, %v221_v48  ;;  %v427_v51 = vpop.f32.mrb[3].mxu0  ;;  %v225_v56 = vmul.f32 0.5, %v219_v46 }
 0x24d   :  { %478 = verf.f32 %v227_v49  ;;  %v228_v52 = vmul.f32 0.70710677, %v222_v50  ;;  %v226_v57 = vmul.f32 0.5, %v222_v50 }
 0x24f   :  { %480 = verf.f32 %v228_v52 }
 0x257   :  { %v479_v53 = vpop.eup %478 }
 0x258   :  { %v231_v54 = vadd.f32 1.0, %v479_v53 }
 0x259   :  { %v481_v55 = vpop.eup %480 }
 0x25a   :  { %v232_v58 = vadd.f32 1.0, %v481_v55  ;;  %v233_v59 = vmul.f32 %v231_v54, %v225_v56 }
 0x25c   :  { %v234_v60 = vmul.f32 %v232_v58, %v226_v57 }
 0x25e   :  { %v235_v61 = vpack.c.bf16 %v234_v60, %v233_v59 }
 0x260   :  { %445 = vmatmul.mubr.bf16.vlgmr.msra.gmra.mrb[0].mxu1 %v235_v61 }
 0x333   :  { %v341_v63 = vpop.f32.mrb[0].mxu1 }
 0x334   :  { %v342_v0 = vadd.f32 %v381_v62, %v341_v63  ;;  %v446_v1 = vpop.f32.mrb[1].mxu1 }
 0x335   :  { %v344_v2 = vpop.f32.mrb[2].mxu1 }
 0x336   :  { %v348_v3 = vadd.f32 %v342_v0, %v110_v35  ;;  %v345_v4 = vadd.f32 %v381_v62, %v344_v2  ;;  %v447_v5 = vpop.f32.mrb[3].mxu1 }
 0x338   :  { %350 = vst [vmem:[#allocation8] sm:$0xff] %v348_v3  ;;  %v349_v6 = vadd.f32 %v345_v4, %v111_v36 }
 0x33a   :  { %351 = vst [vmem:[#allocation8 + $0x8] sm:$0xff] %v349_v6 }
 0x33b   :  { %559 = shalt.err (!%p556_p0)
}
 0x33c   :  { %s560_s24 = scalar_lea.hbm %s723_s7, 256 }
 0x33d   :  { %p561_p1 = scmp.ne.s32.totalorder %s723_s7, %s560_s24  ;;  %p564_p2 = scmp.lt.u32.totalorder %s560_s24, %s723_s7 }
 0x33f   :  { %p566_p3 = pnand %p564_p2, %p561_p1 }
 0x341   :  { %569 = shalt.err (!%p566_p3)
}
 0x342   :  { %363 = dma.vmem_to_hbm [thread:$0]  %s358_s21, 256, %s723_s7, [#allocation4], %s580_s3, %s580_s3, %s581_s25  }
 0x343   :  { %574 = dma.done.wait [#allocation4], 256  }
 0x344   :  { %575 = vsyncadd [#allocation4], 4294967040 }
 0x345   :  { %367 = vsyncpa [#allocation3], 1 }
 0x346   :  { %368 = vsyncpa [#allocation6], 1 }
 0x347   :  { %369 = vsyncpa [#allocation4], 1 }

</bundles_post_ra>
